<compile_context>
chip_gen: v7x
topology: tpu7x:2x2x1
jax: 0.10.0
libtpu: 0.0.40
codegen_flags: <defaults>
</compile_context>

<pallas_src>
import functools

import jax
import jax.numpy as jnp
import numpy as np
from jax.experimental import pallas as pl
from jax.experimental.pallas import tpu as pltpu


def _round_up(x, m):
    return (x + m - 1) // m * m


# ----------------------------------------------------------------------------
# Kernel 1: frame-level path — flattened (B*T) M-tiled MLP (frontend + OutputLayer)
# ----------------------------------------------------------------------------
def _mlp_kernel(x_ref, w1_ref, b1_ref, w2_ref, b2_ref, o_ref):
    x = x_ref[...].astype(jnp.bfloat16)                                  # (m, Din)
    h = jnp.dot(x, w1_ref[...], preferred_element_type=jnp.float32) + b1_ref[...]
    h = jnp.maximum(h, 0.0)
    o_ref[...] = (jnp.dot(h.astype(jnp.bfloat16), w2_ref[...],
                          preferred_element_type=jnp.float32) + b2_ref[...])


def _mlp_frames(x, w1b, b1f, w2b, b2f):
    """x: (B, T, Din) f32; returns frame-level scores (B, T, C) f32."""
    B, T, Din = x.shape
    H = w1b.shape[1]
    C = w2b.shape[1]
    M = B * T
    m_tile = M if M <= 1024 else 1024          # big tiles amortize per-step overhead
    x2 = x.reshape(M, Din)                     # view-level reshape, no copy
    out = pl.pallas_call(
        _mlp_kernel,
        out_shape=jax.ShapeDtypeStruct((M, C), jnp.float32),
        grid=(pl.cdiv(M, m_tile),),
        in_specs=[
            pl.BlockSpec((m_tile, Din), lambda i: (i, 0)),
            pl.BlockSpec((Din, H), lambda i: (0, 0)),   # weights resident
            pl.BlockSpec((1, H), lambda i: (0, 0)),
            pl.BlockSpec((H, C), lambda i: (0, 0)),
            pl.BlockSpec((1, C), lambda i: (0, 0)),
        ],
        out_specs=pl.BlockSpec((m_tile, C), lambda i: (i, 0)),
        compiler_params=pltpu.CompilerParams(dimension_semantics=("parallel",)),
    )(x2, w1b, b1f, w2b, b2f)
    return out.reshape(B, T, C)


# ----------------------------------------------------------------------------
# Shared in-kernel helpers for the fused phone-level kernels
# ----------------------------------------------------------------------------
def _frontend_chunk(x_ref, w1_ref, b1_ref, w2_ref, b2_ref):
    x = x_ref[0].astype(jnp.bfloat16)                                    # (Tt, Din)
    h = jnp.dot(x, w1_ref[...], preferred_element_type=jnp.float32) + b1_ref[...]
    h = jnp.maximum(h, 0.0)
    return (jnp.dot(h.astype(jnp.bfloat16), w2_ref[...],
                    preferred_element_type=jnp.float32) + b2_ref[...])   # (Tt, C) f32


def _masked_and_tgt(logits, tgt, t0, t_total, ragged):
    """Apply |target| mask and (if ragged) zero out-of-range tail frames."""
    prod = logits * jnp.abs(tgt)
    if ragged:
        Tt, C = logits.shape
        t_idx = jax.lax.broadcasted_iota(jnp.int32, (Tt, C), 0) + t0
        valid = t_idx < t_total
        prod = jnp.where(valid, prod, 0.0)
        tgt = jnp.where(valid, tgt, 0.0)
    return prod.astype(jnp.bfloat16), tgt


def _segment_matrix(meta_ref, Tt, t0):
    # seg[p, t] = 1 if start[p] <= t_global <= end[p]   (P on sublanes, T on lanes)
    meta = meta_ref[0]                                                   # (Pp, 2) int32
    starts = meta[:, 0:1]
    ends = meta[:, 1:2]
    Pp = meta.shape[0]
    t_idx = jax.lax.broadcasted_iota(jnp.int32, (Pp, Tt), 1) + t0
    return ((t_idx >= starts) & (t_idx <= ends)).astype(jnp.bfloat16)    # (Pp, Tt)


# ----------------------------------------------------------------------------
# Kernel 2: fused frontend + OutputLayer + summarize_outputs_per_phone
#   grid = (B, nT): B parallel, T-chunks arbitrary (accumulated in VMEM scratch)
# ----------------------------------------------------------------------------
def _fused_summarize_kernel(x_ref, w1_ref, b1_ref, w2_ref, b2_ref,
                            tgt_ref, meta_ref, o_ref,
                            acc_sums, acc_counts,
                            *, normalize, t_total, t_tile, ragged):
    tc = pl.program_id(1)

    @pl.when(tc == 0)
    def _():
        acc_sums[...] = jnp.zeros_like(acc_sums)
        if normalize:
            acc_counts[...] = jnp.zeros_like(acc_counts)

    t0 = tc * t_tile
    logits = _frontend_chunk(x_ref, w1_ref, b1_ref, w2_ref, b2_ref)      # (Tt, C) f32
    masked, tgt = _masked_and_tgt(logits, tgt_ref[0], t0, t_total, ragged)
    seg = _segment_matrix(meta_ref, logits.shape[0], t0)                 # (Pp, Tt) bf16

    acc_sums[...] += jnp.dot(seg, masked, preferred_element_type=jnp.float32)
    if normalize:
        acc_counts[...] += jnp.dot(seg, tgt.astype(jnp.bfloat16),
                                   preferred_element_type=jnp.float32)

    @pl.when(tc == pl.num_programs(1) - 1)
    def _():
        sums = acc_sums[...]
        if normalize:
            counts = acc_counts[...]
            counts = jnp.where(counts == 0.0, 1.0, counts)
            sums = sums / counts
        o_ref[0] = sums


def _fused_summarize(x, w1b, b1f, w2b, b2f, tgt, meta, normalize, t_tile):
    B, T, Din = x.shape
    H = w1b.shape[1]
    C = w2b.shape[1]
    Pp = meta.shape[1]
    nT = pl.cdiv(T, t_tile)
    kern = functools.partial(_fused_summarize_kernel, normalize=bool(normalize),
                             t_total=T, t_tile=t_tile, ragged=(nT * t_tile != T))
    return pl.pallas_call(
        kern,
        out_shape=jax.ShapeDtypeStruct((B, Pp, C), jnp.float32),
        grid=(B, nT),
        in_specs=[
            pl.BlockSpec((1, t_tile, Din), lambda b, t: (b, t, 0)),
            pl.BlockSpec((Din, H), lambda b, t: (0, 0)),
            pl.BlockSpec((1, H), lambda b, t: (0, 0)),
            pl.BlockSpec((H, C), lambda b, t: (0, 0)),
            pl.BlockSpec((1, C), lambda b, t: (0, 0)),
            pl.BlockSpec((1, t_tile, C), lambda b, t: (b, t, 0)),
            pl.BlockSpec((1, Pp, 2), lambda b, t: (b, 0, 0)),
        ],
        out_specs=pl.BlockSpec((1, Pp, C), lambda b, t: (b, 0, 0)),
        scratch_shapes=[pltpu.VMEM((Pp, C), jnp.float32),
                        pltpu.VMEM((Pp, C), jnp.float32)],
        compiler_params=pltpu.CompilerParams(
            dimension_semantics=("parallel", "arbitrary")),
    )(x, w1b, b1f, w2b, b2f, tgt, meta)


# ----------------------------------------------------------------------------
# Kernel 3: fused frontend + OutputLayer + forward_by_phone (evaluation path)
# ----------------------------------------------------------------------------
def _fused_eval_kernel(x_ref, w1_ref, b1_ref, w2_ref, b2_ref,
                       tgt_ref, meta_ref, durs_ref, o_ref, acc,
                       *, t_total, t_tile, ragged):
    tc = pl.program_id(1)

    @pl.when(tc == 0)
    def _():
        acc[...] = jnp.zeros_like(acc)

    t0 = tc * t_tile
    logits = _frontend_chunk(x_ref, w1_ref, b1_ref, w2_ref, b2_ref)      # (Tt, C) f32
    masked, _ = _masked_and_tgt(logits, tgt_ref[0], t0, t_total, ragged)
    seg = _segment_matrix(meta_ref, logits.shape[0], t0)                 # (Pp, Tt) bf16

    sums_pc = jnp.dot(seg, masked, preferred_element_type=jnp.float32)   # (Pp, C)
    acc[...] += jnp.sum(sums_pc, axis=1, keepdims=True)                  # (Pp, 1)

    @pl.when(tc == pl.num_programs(1) - 1)
    def _():
        o_ref[0] = jnp.nan_to_num(acc[...] / durs_ref[0])


def _fused_eval(x, w1b, b1f, w2b, b2f, tgt, meta, durs, t_tile):
    B, T, Din = x.shape
    H = w1b.shape[1]
    C = w2b.shape[1]
    Pp = meta.shape[1]
    nT = pl.cdiv(T, t_tile)
    kern = functools.partial(_fused_eval_kernel,
                             t_total=T, t_tile=t_tile, ragged=(nT * t_tile != T))
    return pl.pallas_call(
        kern,
        out_shape=jax.ShapeDtypeStruct((B, Pp, 1), jnp.float32),
        grid=(B, nT),
        in_specs=[
            pl.BlockSpec((1, t_tile, Din), lambda b, t: (b, t, 0)),
            pl.BlockSpec((Din, H), lambda b, t: (0, 0)),
            pl.BlockSpec((1, H), lambda b, t: (0, 0)),
            pl.BlockSpec((H, C), lambda b, t: (0, 0)),
            pl.BlockSpec((1, C), lambda b, t: (0, 0)),
            pl.BlockSpec((1, t_tile, C), lambda b, t: (b, t, 0)),
            pl.BlockSpec((1, Pp, 2), lambda b, t: (b, 0, 0)),
            pl.BlockSpec((1, Pp, 1), lambda b, t: (b, 0, 0)),
        ],
        out_specs=pl.BlockSpec((1, Pp, 1), lambda b, t: (b, 0, 0)),
        scratch_shapes=[pltpu.VMEM((Pp, 1), jnp.float32)],
        compiler_params=pltpu.CompilerParams(
            dimension_semantics=("parallel", "arbitrary")),
    )(x, w1b, b1f, w2b, b2f, tgt, meta, durs)


# ----------------------------------------------------------------------------
# Full module forward (mirrors FTDNNPronscorer.forward)
# ----------------------------------------------------------------------------
def ftdnn_pronscorer_forward(x, params, loss_per_phone, evaluation,
                             batch_target_phones, batch_indexes, normalize,
                             phone_durs=None):
    w1, b1, w2, b2 = params
    B, T, _ = x.shape
    H = w1.shape[1]
    C = w2.shape[1]

    # bf16 MXU weights (tiny, one-time host casts); biases f32.
    x = x.astype(jnp.float32)                    # no-op if already f32 (cast in-kernel to bf16)
    w1b = w1.astype(jnp.bfloat16)
    b1f = b1.astype(jnp.float32).reshape(1, H)
    w2b = w2.astype(jnp.bfloat16)
    b2f = b2.astype(jnp.float32).reshape(1, C)

    if loss_per_phone and evaluation:
        # TODO(synk): the torch composition applies forward_by_phone to the already
        # phone-summarized tensor, which is shape-inconsistent unless P == T; guarded.
        raise ValueError("loss_per_phone and evaluation cannot both be set")

    if not (loss_per_phone or evaluation):
        return _mlp_frames(x, w1b, b1f, w2b, b2f)              # (B, T, C) frame scores

    # Phone-level paths: build per-phone [start, end] segments from the inclusive
    # end-frame indices (ascending, as required by the torch cumsum-diff formulation).
    ends = batch_indexes[1].astype(jnp.int32)                  # (B, P)
    P = ends.shape[1]
    Pp = max(8, _round_up(P, 8))
    starts = jnp.concatenate(
        [jnp.zeros((B, 1), jnp.int32), ends[:, :-1] + 1], axis=1)        # (B, P)
    # Padded phones get an empty segment (start=1 > end=0) -> zero rows, sliced away.
    starts_p = jnp.pad(starts, ((0, 0), (0, Pp - P)), constant_values=1)
    ends_p = jnp.pad(ends, ((0, 0), (0, Pp - P)), constant_values=0)
    meta = jnp.stack([starts_p, ends_p], axis=-1)              # (B, Pp, 2) int32

    tgt = batch_target_phones.astype(jnp.float32)              # (B, T, C), unpadded
    t_tile = T if T <= 512 else 512

    if loss_per_phone:
        res = _fused_summarize(x, w1b, b1f, w2b, b2f, tgt, meta, normalize, t_tile)
        return res[:, :P, :]                                   # (B, P, C)

    # evaluation path
    durs = jnp.pad(phone_durs.astype(jnp.float32),
                   ((0, 0), (0, Pp - P)), constant_values=1.0).reshape(B, Pp, 1)
    res = _fused_eval(x, w1b, b1f, w2b, b2f, tgt, meta, durs, t_tile)
    return res[:, :P, 0]                                       # (B, P)


# ----------------------------------------------------------------------------
# Pure-JAX references (sanity checks; mirror the kernel's bf16 operand rounding)
# ----------------------------------------------------------------------------
def _mlp_ref(x, w1, b1, w2, b2):
    xb = x.astype(jnp.bfloat16)
    w1b = w1.astype(jnp.bfloat16)
    w2b = w2.astype(jnp.bfloat16)
    h = jnp.einsum("btd,dh->bth", xb, w1b,
                   preferred_element_type=jnp.float32) + b1.reshape(1, 1, -1)
    h = jnp.maximum(h, 0.0)
    return (jnp.einsum("bth,hc->btc", h.astype(jnp.bfloat16), w2b,
                       preferred_element_type=jnp.float32) + b2.reshape(1, 1, -1))


def _summarize_ref(outputs, tgt, ends, normalize):
    B, T, C = outputs.shape
    masked = (outputs * jnp.abs(tgt)).astype(jnp.bfloat16).astype(jnp.float32)
    cs = jnp.cumsum(masked, axis=1)
    g = jax.vmap(lambda m, e: m[e])(cs, ends)                          # (B, P, C)
    g = jnp.concatenate([jnp.zeros((B, 1, C), jnp.float32), g], axis=1)
    sums = jnp.diff(g, axis=1)
    if normalize:
        cc = jnp.cumsum(tgt, axis=1)
        gc = jax.vmap(lambda m, e: m[e])(cc, ends)
        gc = jnp.concatenate([jnp.zeros((B, 1, C), jnp.float32), gc], axis=1)
        cnt = jnp.diff(gc, axis=1)
        cnt = jnp.where(cnt == 0.0, 1.0, cnt)
        sums = sums / cnt
    return sums


def _forward_by_phone_ref(outputs, tgt, ends, durs):
    B = outputs.shape[0]
    masked = (outputs * jnp.abs(tgt)).astype(jnp.bfloat16).astype(jnp.float32)
    collapsed = jnp.sum(masked, axis=2)
    cs = jnp.cumsum(collapsed, axis=1)
    g = jax.vmap(lambda m, e: m[e])(cs, ends)                          # (B, P)
    g = jnp.concatenate([jnp.zeros((B, 1), jnp.float32), g], axis=1)
    return jnp.nan_to_num(jnp.diff(g, axis=1) / durs)


# ----------------------------------------------------------------------------
if __name__ == "__main__":
    B, T, Din, H, C, P = 2, 16, 32, 256, 40, 4

    key = jax.random.PRNGKey(0)
    k1, k2, k3, k4, k5, k6 = jax.random.split(key, 6)

    x = jax.random.normal(k1, (B, T, Din), jnp.float32)
    w1 = 0.1 * jax.random.normal(k2, (Din, H), jnp.float32)
    b1 = 0.01 * jax.random.normal(k3, (1, H), jnp.float32)
    w2 = 0.1 * jax.random.normal(k4, (H, C), jnp.float32)
    b2 = 0.01 * jax.random.normal(k5, (1, C), jnp.float32)
    params = (w1, b1, w2, b2)

    # Phone targets: one-hot over out_dim per frame, P phones of equal duration.
    frames_per_phone = T // P
    phone_ids = jax.random.randint(k6, (B, P), 0, C)
    frame_phone = jnp.repeat(phone_ids, frames_per_phone, axis=1)      # (B, T)
    batch_target_phones = jax.nn.one_hot(frame_phone, C, dtype=jnp.float32)

    ends = jnp.tile(jnp.arange(1, P + 1) * frames_per_phone - 1, (B, 1)).astype(jnp.int32)
    batch_idx_row = jnp.broadcast_to(jnp.arange(B, dtype=jnp.int32)[:, None], (B, P))
    batch_indexes = jnp.stack([batch_idx_row, ends]).astype(jnp.int32)  # (2, B, P)
    phone_durs = jnp.full((B, P), float(frames_per_phone), jnp.float32)

    # 1) plain frame-level scores
    out_frames = ftdnn_pronscorer_forward(
        x, params, loss_per_phone=False, evaluation=False,
        batch_target_phones=batch_target_phones, batch_indexes=batch_indexes,
        normalize=True)
    # 2) loss_per_phone path (summarize_outputs_per_phone, normalized)
    out_phone = ftdnn_pronscorer_forward(
        x, params, loss_per_phone=True, evaluation=False,
        batch_target_phones=batch_target_phones, batch_indexes=batch_indexes,
        normalize=True)
    # 3) evaluation path (forward_by_phone)
    out_eval = ftdnn_pronscorer_forward(
        x, params, loss_per_phone=False, evaluation=True,
        batch_target_phones=batch_target_phones, batch_indexes=batch_indexes,
        normalize=False, phone_durs=phone_durs)

    jax.block_until_ready((out_frames, out_phone, out_eval))

    # Sanity checks against pure-JAX references (bf16 MXU operands bound the error).
    ref_frames = _mlp_ref(x, w1, b1, w2, b2)
    np.testing.assert_allclose(np.asarray(out_frames), np.asarray(ref_frames),
                               rtol=2e-3, atol=2e-3)
    np.testing.assert_allclose(
        np.asarray(out_phone),
        np.asarray(_summarize_ref(ref_frames, batch_target_phones, ends, True)),
        rtol=1e-2, atol=1e-2)
    np.testing.assert_allclose(
        np.asarray(out_eval),
        np.asarray(_forward_by_phone_ref(ref_frames, batch_target_phones, ends,
                                         phone_durs)),
        rtol=1e-2, atol=1e-2)

    print("KERNEL_OK")
</pallas_src>

<mosaic_0001>
module attributes {stable_mosaic.version = 11 : i64} {
  func.func @_mlp_kernel(%arg0: i32, %arg1: memref<32x32xf32, #tpu.memory_space<vmem>>, %arg2: memref<32x256xbf16, #tpu.memory_space<vmem>>, %arg3: memref<1x256xf32, #tpu.memory_space<vmem>>, %arg4: memref<256x40xbf16, #tpu.memory_space<vmem>>, %arg5: memref<1x40xf32, #tpu.memory_space<vmem>>, %arg6: memref<32x40xf32, #tpu.memory_space<vmem>>) attributes {dimension_semantics = [#tpu.dimension_semantics<parallel>], iteration_bounds = array<i64: 1>, scalar_prefetch = 0 : i64, scratch_operands = 0 : i64, tpu.core_type = #tpu.core_type<tc>, window_params = [{transform_indices = @transform_0, window_bounds = array<i64: 32, 32>}, {pipeline_mode = #tpu.pipeline_mode<synchronous>, transform_indices = @transform_1, window_bounds = array<i64: 32, 256>}, {pipeline_mode = #tpu.pipeline_mode<synchronous>, transform_indices = @transform_2, window_bounds = array<i64: 1, 256>}, {pipeline_mode = #tpu.pipeline_mode<synchronous>, transform_indices = @transform_3, window_bounds = array<i64: 256, 40>}, {pipeline_mode = #tpu.pipeline_mode<synchronous>, transform_indices = @transform_4, window_bounds = array<i64: 1, 40>}, {transform_indices = @transform_5, window_bounds = array<i64: 32, 40>}]} {
    %c0 = arith.constant 0 : index
    %c0_0 = arith.constant 0 : index
    %0 = vector.load %arg1[%c0, %c0_0] : memref<32x32xf32, #tpu.memory_space<vmem>>, vector<32x32xf32>
    %1 = arith.truncf %0 : vector<32x32xf32> to vector<32x32xbf16>
    %c0_1 = arith.constant 0 : index
    %c0_2 = arith.constant 0 : index
    %2 = vector.load %arg2[%c0_1, %c0_2] : memref<32x256xbf16, #tpu.memory_space<vmem>>, vector<32x256xbf16>
    %cst = arith.constant dense<0.000000e+00> : vector<32x256xf32>
    %3 = tpu.matmul %1, %2, %cst {dimension_numbers = #tpu.dot_dimension_numbers<[1], [0], [0], [1], [0, 0, 1, 1], [], []>} : vector<32x32xbf16>, vector<32x256xbf16>, vector<32x256xf32> -> vector<32x256xf32>
    %c0_3 = arith.constant 0 : index
    %c0_4 = arith.constant 0 : index
    %4 = vector.load %arg3[%c0_3, %c0_4] : memref<1x256xf32, #tpu.memory_space<vmem>>, vector<1x256xf32>
    %5 = vector.broadcast %4 : vector<1x256xf32> to vector<32x256xf32>
    %6 = arith.addf %3, %5 : vector<32x256xf32>
    %cst_5 = arith.constant 0.000000e+00 : f32
    %7 = vector.broadcast %cst_5 : f32 to vector<32x256xf32>
    %8 = arith.maximumf %6, %7 : vector<32x256xf32>
    %9 = arith.truncf %8 : vector<32x256xf32> to vector<32x256xbf16>
    %c0_6 = arith.constant 0 : index
    %c0_7 = arith.constant 0 : index
    %10 = vector.load %arg4[%c0_6, %c0_7] : memref<256x40xbf16, #tpu.memory_space<vmem>>, vector<256x40xbf16>
    %cst_8 = arith.constant dense<0.000000e+00> : vector<32x40xf32>
    %11 = tpu.matmul %9, %10, %cst_8 {dimension_numbers = #tpu.dot_dimension_numbers<[1], [0], [0], [1], [0, 0, 1, 1], [], []>} : vector<32x256xbf16>, vector<256x40xbf16>, vector<32x40xf32> -> vector<32x40xf32>
    %c0_9 = arith.constant 0 : index
    %c0_10 = arith.constant 0 : index
    %12 = vector.load %arg5[%c0_9, %c0_10] : memref<1x40xf32, #tpu.memory_space<vmem>>, vector<1x40xf32>
    %13 = vector.broadcast %12 : vector<1x40xf32> to vector<32x40xf32>
    %14 = arith.addf %11, %13 : vector<32x40xf32>
    %c0_11 = arith.constant 0 : index
    %c0_12 = arith.constant 0 : index
    %15 = vector.load %arg6[%c0_11, %c0_12] : memref<32x40xf32, #tpu.memory_space<vmem>>, vector<32x40xf32>
    tpu.vector_store %arg6[%c0_11, %c0_12], %14 {strides = array<i32>} : memref<32x40xf32, #tpu.memory_space<vmem>>, vector<32x40xf32>,
    return
  }
  func.func @transform_0(%arg0: i32) -> (i32, i32) {
    %c0_i32 = arith.constant 0 : i32
    %c0_i32_0 = arith.constant 0 : i32
    return %arg0, %c0_i32 : i32, i32
  }
  func.func @transform_1(%arg0: i32) -> (i32, i32) {
    %c0_i32 = arith.constant 0 : i32
    %c0_i32_0 = arith.constant 0 : i32
    %c0_i32_1 = arith.constant 0 : i32
    return %c0_i32, %c0_i32_0 : i32, i32
  }
  func.func @transform_2(%arg0: i32) -> (i32, i32) {
    %c0_i32 = arith.constant 0 : i32
    %c0_i32_0 = arith.constant 0 : i32
    %c0_i32_1 = arith.constant 0 : i32
    return %c0_i32, %c0_i32_0 : i32, i32
  }
  func.func @transform_3(%arg0: i32) -> (i32, i32) {
    %c0_i32 = arith.constant 0 : i32
    %c0_i32_0 = arith.constant 0 : i32
    %c0_i32_1 = arith.constant 0 : i32
    return %c0_i32, %c0_i32_0 : i32, i32
  }
  func.func @transform_4(%arg0: i32) -> (i32, i32) {
    %c0_i32 = arith.constant 0 : i32
    %c0_i32_0 = arith.constant 0 : i32
    %c0_i32_1 = arith.constant 0 : i32
    return %c0_i32, %c0_i32_0 : i32, i32
  }
  func.func @transform_5(%arg0: i32) -> (i32, i32) {
    %c0_i32 = arith.constant 0 : i32
    %c0_i32_0 = arith.constant 0 : i32
    return %arg0, %c0_i32 : i32, i32
  }
}

</mosaic_0001>

<bundles_post_ra>
// kernel: tpu_custom_call.1
= control target key start
LH: loop header
LB: loop body
LE: loop exit
PB: predicated region body
PF: predicated region fallthrough
CT: control target
= control target key end

     0   :  { %v442_v2 = vmov 0   ;;  %vm64_vm0 = vcmask 261120   ;;  %s572_s0 = inlined_call_operand.vmem [shape: f32[32,32], index: 0, kind: input, shape index: {}]   ;;  %s573_s1 = inlined_call_operand.vmem [shape: bf16[32,256], index: 1, kind: input, shape index: {}]   ;;  %s574_s2 = inlined_call_operand.vmem [shape: f32[1,256], index: 2, kind: input, shape index: {}]   ;;  %s575_s3 = inlined_call_operand.vmem [shape: bf16[256,40], index: 3, kind: input, shape index: {}]   ;;  %s576_s4 = inlined_call_operand.vmem [shape: f32[1,40], index: 4, kind: input, shape index: {}]   ;;  %s577_s5 = inlined_call_operand.hbm [shape: f32[32,40], index: 5, kind: output, shape index: {}]  }
   0x1   :  { %v396_v0 = vld [vmem:[%s573_s1 + $0x4] ss:$8 sps:$4 sm:$0xff]   ;;  %v398_v1 = vld [vmem:[%s573_s1] ss:$8 sps:$4 sm:$0xff]   ;;  %103 = vmatprep.mubr.bf16.mxu0 %v442_v2  ;;  %v399_v3 = vld [vmem:[%s573_s1 + $0x14] ss:$8 sps:$4 sm:$0xff]  }
   0x2   :  { %71 = vmatprep.subr.bf16.mxu0 %v396_v0  ;;  %v401_v4 = vld [vmem:[%s573_s1 + $0x10] ss:$8 sps:$4 sm:$0xff]   ;;  %v22_v5 = vld [vmem:[%s572_s0] sm:$0xff]  ;;  %v23_v6 = vld [vmem:[%s572_s0 + $0x8] sm:$0xff] }
   0x3   :  { %72 = vmatpush1.bf16.msra.mxu0 %v398_v1  ;;  %v402_v7 = vld [vmem:[%s575_s3 + $0x40] sm:$0xff]   ;;  %v26_v9 = vpack.c.bf16 %v23_v6, %v22_v5  ;;  %v404_v10 = vld [vmem:[%s575_s3 + $0x48] sm:$0xff]   ;;  %v406_v12 = vld [vmem:[%s575_s3 + $0x50] sm:$0xff]  }
   0x4   :  { %73 = vmatprep.subr.bf16.mxu0 %v399_v3  ;;  %v403_v8 = vld [vmem:[%s575_s3] sm:$0xff]   ;;  %364 = vmatprep.subr.bf16.mxu1 %v402_v7  ;;  %v405_v11 = vld [vmem:[%s575_s3 + $0x8] sm:$0xff]   ;;  %v24_v13 = vld [vmem:[%s572_s0 + $0x10] sm:$0xff] }
   0x5   :  { %365 = vmatpush3.bf16.msra.mxu1 %v403_v8  ;;  %v25_v14 = vld [vmem:[%s572_s0 + $0x18] sm:$0xff]  ;;  %v407_v15 = vld [vmem:[%s575_s3 + $0x10] sm:$0xff]   ;;  %v410_v19 = vld [vmem:[%s575_s3 + $0x60] sm:$0xff]  }
   0x6   :  { %366 = vmatprep.subr.bf16.mxu1 %v404_v10  ;;  %v408_v16 = vld [vmem:[%s575_s3 + $0x58] sm:$0xff]   ;;  %v27_v17 = vpack.c.bf16 %v25_v14, %v24_v13 }
   0x7   :  { %74 = vmatpush1.bf16.msra.mxu0 %v401_v4  ;;  %v409_v18 = vld [vmem:[%s575_s3 + $0x18] sm:$0xff]  }
   0x9   :  { %367 = vmatpush3.bf16.msra.mxu1 %v405_v11 }
   0xa   :  { %345 = vmatmul.mubr.msk.bf16.vlgmr.msra.gmra.mrb[0].mxu0 %vm64_vm0, %v26_v9  ;;  %368 = vmatprep.subr.bf16.mxu1 %v406_v12 }
   0xb   :  { %113 = vmatprep.mubr.bf16.mxu0 %v442_v2 }
   0xd   :  { %369 = vmatpush3.bf16.msra.mxu1 %v407_v15 }
   0xe   :  { %370 = vmatprep.subr.bf16.mxu1 %v408_v16 }
  0x12   :  { %346 = vmatmul.mubr.msk.bf16.gmra.mrb[4].mxu0 %vm64_vm0, %v27_v17 }
  0x13   :  { %10 = vsyncpa [#allocation3], 0  ;;  %371 = vmatpush3.bf16.msra.mxu1 %v409_v18  ;;  %v411_v20 = vld [vmem:[%s575_s3 + $0x20] sm:$0xff]   ;;  %v412_v21 = vld [vmem:[%s575_s3 + $0x68] sm:$0xff]   ;;  %v34_v27 = vlaneseq  ;;  %vm320_vm1 = vcmask 326656   ;;  %s443_s15 = smov [#allocation2]  }
  0x14   :  { %372 = vmatprep.subr.bf16.mxu1 %v410_v19  ;;  %v413_v22 = vld [vmem:[%s575_s3 + $0x28] sm:$0xff]   ;;  %v414_v23 = vld [vmem:[%s575_s3 + $0x70] sm:$0xff]   ;;  %v416_v25 = vld [vmem:[%s575_s3 + $0x78] sm:$0xff]   ;;  %s330_s16 = sshll.u32 %s443_s15, 4  ;;  %s331_s16 = int_to_ptr.vmem [resolvable:$true] %s330_s16 }
  0x15   :  { %v415_v24 = vld [vmem:[%s575_s3 + $0x30] sm:$0xff]   ;;  %v417_v26 = vld [vmem:[%s575_s3 + $0x38] sm:$0xff]   ;;  %v35_v28 = vshrl.u32 %v34_v27, 7  ;;  %v32_v30 = vld [vmem:[%s574_s2] sm:$0x3]  ;;  %p423_p1 = scmp.lt.s32.totalorder %s331_s16, %s331_s16 }
  0x16   :  { %v347_v63 = vld [vmem:[%s576_s4] ss:$0 sm:$0xff]  ;;  %s418_s4 = scalar_lea.vmem %s331_s16, 512 }
  0x17   :  { %373 = vmatpush3.bf16.msra.mxu1 %v411_v20  ;;  %v36_v29 = vsub.s32 0, %v35_v28  ;;  %v40_v31 = vsub.s32 1, %v35_v28  ;;  %p419_p0 = scmp.ne.s32.totalorder %s331_s16, %s418_s4  ;;  %p424_p2 = scmp.lt.s32.totalorder %s418_s4, %s418_s4 }
  0x18   :  { %374 = vmatprep.subr.bf16.mxu1 %v412_v21 }
  0x19   :  { %v37_v32 = vrot.slane %v32_v30, %v36_v29  ;;  %v41_v33 = vrot.slane %v32_v30, %v40_v31  ;;  %p425_p3 = por %p424_p2, %p423_p1 }
  0x1b   :  { %375 = vmatpush3.bf16.msra.mxu1 %v413_v22  ;;  %p426_p4 = pnand %p425_p3, %p419_p0 }
  0x1c   :  { %376 = vmatprep.subr.bf16.mxu1 %v414_v23 }
  0x1f   :  { %377 = vmatpush3.bf16.msra.mxu1 %v415_v24 }
  0x20   :  { %378 = vmatprep.subr.bf16.mxu1 %v416_v25 }
  0x23   :  { %379 = vmatpush3.bf16.msra.mxu1 %v417_v26 }
  0xdd   :  { %v105_v34 = vpop.f32.mrb[0].mxu0 }
  0xde   :  { %v106_v35 = vadd.f32 %v105_v34, %v37_v32  ;;  %v107_v36 = vpop.f32.mrb[1].mxu0 }
  0xdf   :  { %v108_v37 = vadd.f32 %v107_v36, %v41_v33  ;;  %v109_v38 = vpop.f32.mrb[2].mxu0 }
  0xe0   :  { %v110_v39 = vadd.f32 %v109_v38, %v37_v32  ;;  %v111_v40 = vpop.f32.mrb[3].mxu0  ;;  %v124_v42 = vmax.f32 %v106_v35, 0.0 }
  0xe1   :  { %v112_v41 = vadd.f32 %v111_v40, %v41_v33  ;;  %v125_v44 = vmax.f32 %v108_v37, 0.0 }
  0xe2   :  { %v126_v43 = vmax.f32 %v110_v39, 0.0 }
  0xe3   :  { %v127_v45 = vmax.f32 %v112_v41, 0.0 }
  0xe4   :  { %v132_v46 = vpack.c.bf16 %v126_v43, %v124_v42 }
  0xe5   :  { %v115_v47 = vpop.f32.mrb[4].mxu0  ;;  %v133_v48 = vpack.c.bf16 %v127_v45, %v125_v44 }
  0xe6   :  { %v116_v49 = vadd.f32 %v115_v47, %v37_v32  ;;  %v117_v50 = vpop.f32.mrb[5].mxu0 }
  0xe7   :  { %v118_v51 = vadd.f32 %v117_v50, %v41_v33  ;;  %v119_v52 = vpop.f32.mrb[6].mxu0  ;;  %303 = vmatprep.mubr.bf16.mxu1 %v133_v48 }
  0xe8   :  { %v120_v53 = vadd.f32 %v119_v52, %v37_v32  ;;  %v121_v54 = vpop.f32.mrb[7].mxu0  ;;  %304 = vmatmul.mubr.bf16.vlgmr.msra.gmra.mrb[0].mxu1 %v132_v46  ;;  %v128_v56 = vmax.f32 %v116_v49, 0.0 }
  0xe9   :  { %v122_v55 = vadd.f32 %v121_v54, %v41_v33  ;;  %v129_v58 = vmax.f32 %v118_v51, 0.0 }
  0xea   :  { %v130_v57 = vmax.f32 %v120_v53, 0.0 }
  0xeb   :  { %v131_v59 = vmax.f32 %v122_v55, 0.0 }
  0xec   :  { %v134_v60 = vpack.c.bf16 %v130_v57, %v128_v56 }
  0xed   :  { %v135_v61 = vpack.c.bf16 %v131_v59, %v129_v58 }
  0xef   :  { %311 = vmatprep.mubr.bf16.mxu1 %v135_v61 }
  0xf0   :  { %312 = vmatmul.mubr.bf16.gmra.mrb[4].mxu1 %v134_v60 }
 0x1bb   :  { %v380_v62 = vpop.f32.mrb[0].mxu1 }
 0x1bc   :  { %v381_v0 = vpop.f32.mrb[1].mxu1 }
 0x1bd   :  { %v382_v1 = vadd.f32 %v381_v0, %v380_v62  ;;  %v383_v2 = vpop.f32.mrb[2].mxu1 }
 0x1be   :  { %v384_v3 = vpop.f32.mrb[3].mxu1 }
 0x1bf   :  { %v306_v4 = vadd.f32 %v382_v1, %v347_v63  ;;  %v385_v5 = vadd.f32 %v384_v3, %v383_v2 }
 0x1c1   :  { %321 = vst.msk [vmem:[#allocation2] sm:$0xff] %vm320_vm1, %v306_v4  ;;  %v309_v6 = vadd.f32 %v385_v5, %v347_v63 }
 0x1c3   :  { %322 = vst.msk [vmem:[#allocation2 + $0x8] sm:$0xff] %vm320_vm1, %v309_v6  ;;  %v386_v7 = vpop.f32.mrb[4].mxu1 }
 0x1c4   :  { %v387_v8 = vpop.f32.mrb[5].mxu1 }
 0x1c5   :  { %v388_v9 = vadd.f32 %v387_v8, %v386_v7  ;;  %v389_v10 = vpop.f32.mrb[6].mxu1 }
 0x1c6   :  { %v390_v11 = vpop.f32.mrb[7].mxu1 }
 0x1c7   :  { %v314_v12 = vadd.f32 %v388_v9, %v347_v63  ;;  %v391_v13 = vadd.f32 %v390_v11, %v389_v10 }
 0x1c9   :  { %323 = vst.msk [vmem:[#allocation2 + $0x10] sm:$0xff] %vm320_vm1, %v314_v12  ;;  %v317_v14 = vadd.f32 %v391_v13, %v347_v63 }
 0x1cb   :  { %324 = vst.msk [vmem:[#allocation2 + $0x18] sm:$0xff] %vm320_vm1, %v317_v14 }
 0x1cc   :  { %429 = shalt.err (!%p426_p4)
}
 0x1cd   :  { %s430_s19 = scalar_lea.hbm %s577_s5, 512 }
 0x1ce   :  { %p431_p5 = scmp.ne.s32.totalorder %s577_s5, %s430_s19  ;;  %p434_p6 = scmp.lt.u32.totalorder %s430_s19, %s577_s5 }
 0x1d0   :  { %p436_p7 = pnand %p434_p6, %p431_p5 }
 0x1d2   :  { %439 = shalt.err (!%p436_p7)
}
 0x1d3   :  { %s444_s24 = smov 128   ;;  %s445_s25 = smov 8  }
 0x1d4   :  { %336 = dma.vmem_to_hbm [thread:$0]  %s331_s16, 512, %s577_s5, [#allocation3], %s444_s24, %s444_s24, %s445_s25  }
 0x1d5   :  { %440 = dma.done.wait [#allocation3], 512  }
 0x1d6   :  { %441 = vsyncadd [#allocation3], 4294966784 }
 0x1d7   :  { %340 = vsyncpa [#allocation3], 1 }

</bundles_post_ra>
